<compile_context>
chip_gen: v7x
topology: tpu7x:2x2x1
jax: 0.10.0
libtpu: 0.0.40
codegen_flags: <defaults>
</compile_context>

<pallas_src>
import functools
import math

import jax
import jax.numpy as jnp
from jax.experimental import pallas as pl
from jax.experimental.pallas import tpu as pltpu


def _hmm_embedder_kernel(x_ref, w_ref, b_ref, o_ref):
    """One row tile: out = x @ W + b."""
    x = x_ref[...]                                              # (tm, c_in)
    y = jnp.dot(x, w_ref[...], preferred_element_type=jnp.float32)
    y = y + b_ref[...].astype(jnp.float32)                      # (1, c_m) broadcast
    o_ref[...] = y.astype(o_ref.dtype)


@functools.partial(jax.jit, static_argnames=("tm",))
def hmm_embedder(hmm, w, b, *, tm=1024):
    """
    Args:
        hmm: [*, c_in]   (any number of leading dims)
        w:   [c_in, c_m] (transposed vs torch Linear.weight)
        b:   [c_m]
        tm:  row-tile size (rows per grid step); clamped to the row count.
    Returns:
        [*, c_m]
    """
    c_in = hmm.shape[-1]
    c_m = w.shape[1]
    lead_shape = hmm.shape[:-1]
    m = math.prod(lead_shape) if lead_shape else 1

    x2 = hmm.reshape(m, c_in)
    b2 = b.reshape(1, c_m)

    # Clamp the tile to the available rows; keep it a multiple of 8 (sublanes).
    m_rounded = ((m + 7) // 8) * 8
    tm_eff = min(tm, m_rounded)
    tm_eff = max(8, (tm_eff // 8) * 8)

    grid = (pl.cdiv(m, tm_eff),)   # ragged final block handled by Pallas

    out = pl.pallas_call(
        _hmm_embedder_kernel,
        out_shape=jax.ShapeDtypeStruct((m, c_m), hmm.dtype),
        grid_spec=pltpu.PrefetchScalarGridSpec(
            num_scalar_prefetch=0,
            grid=grid,
            in_specs=[
                pl.BlockSpec((tm_eff, c_in), lambda i: (i, 0)),  # x row tile
                pl.BlockSpec((c_in, c_m), lambda i: (0, 0)),     # W (whole)
                pl.BlockSpec((1, c_m), lambda i: (0, 0)),        # b
            ],
            out_specs=pl.BlockSpec((tm_eff, c_m), lambda i: (i, 0)),
        ),
        compiler_params=pltpu.CompilerParams(
            dimension_semantics=("parallel",)),
    )(x2, w, b2)

    return out.reshape(*lead_shape, c_m)


def _reference(hmm, w, b):
    return jnp.einsum("...i,io->...o", hmm, w) + b


if __name__ == "__main__":
    # Small shapes consistent with the module's forward:
    # hmm: [batch, N_seq, N_res, c_in] -> [batch, N_seq, N_res, c_m]
    batch, n_seq, n_res = 2, 4, 16
    c_in, c_m = 32, 128

    key = jax.random.PRNGKey(0)
    kx, kw, kb = jax.random.split(key, 3)

    hmm = jax.random.normal(kx, (batch, n_seq, n_res, c_in), dtype=jnp.float32)
    # Deterministic synthetic parameters, stored as (in_features, out_features).
    w = jax.random.normal(kw, (c_in, c_m), dtype=jnp.float32) * (1.0 / c_in) ** 0.5
    b = jax.random.normal(kb, (c_m,), dtype=jnp.float32) * 0.02

    y_ref = _reference(hmm, w, b)

    # Default (large, auto-clamped) tile: single lane-dense block.
    y = hmm_embedder(hmm, w, b)
    y = jax.block_until_ready(y)
    assert y.shape == (batch, n_seq, n_res, c_m), y.shape
    assert jnp.allclose(y, y_ref, atol=1e-4, rtol=1e-4), "mismatch vs reference"

    # Multi-step grid with a ragged final block (exercises the no-pad path).
    y2 = hmm_embedder(hmm, w, b, tm=48)
    y2 = jax.block_until_ready(y2)
    assert jnp.allclose(y2, y_ref, atol=1e-4, rtol=1e-4), "mismatch (ragged grid)"

    print("KERNEL_OK")
</pallas_src>

<mosaic_0001>
module attributes {stable_mosaic.version = 11 : i64} {
  func.func @_hmm_embedder_kernel(%arg0: i32, %arg1: memref<128x32xf32, #tpu.memory_space<vmem>>, %arg2: memref<32x128xf32, #tpu.memory_space<vmem>>, %arg3: memref<1x128xf32, #tpu.memory_space<vmem>>, %arg4: memref<128x128xf32, #tpu.memory_space<vmem>>) attributes {dimension_semantics = [#tpu.dimension_semantics<parallel>], iteration_bounds = array<i64: 1>, scalar_prefetch = 0 : i64, scratch_operands = 0 : i64, tpu.core_type = #tpu.core_type<tc>, window_params = [{transform_indices = @transform_0, window_bounds = array<i64: 128, 32>}, {pipeline_mode = #tpu.pipeline_mode<synchronous>, transform_indices = @transform_1, window_bounds = array<i64: 32, 128>}, {pipeline_mode = #tpu.pipeline_mode<synchronous>, transform_indices = @transform_2, window_bounds = array<i64: 1, 128>}, {transform_indices = @transform_3, window_bounds = array<i64: 128, 128>}]} {
    %c0 = arith.constant 0 : index
    %c0_0 = arith.constant 0 : index
    %0 = vector.load %arg1[%c0, %c0_0] : memref<128x32xf32, #tpu.memory_space<vmem>>, vector<128x32xf32>
    %c0_1 = arith.constant 0 : index
    %c0_2 = arith.constant 0 : index
    %1 = vector.load %arg2[%c0_1, %c0_2] : memref<32x128xf32, #tpu.memory_space<vmem>>, vector<32x128xf32>
    %cst = arith.constant dense<0.000000e+00> : vector<128x128xf32>
    %2 = tpu.matmul %0, %1, %cst {dimension_numbers = #tpu.dot_dimension_numbers<[1], [0], [0], [1], [0, 0, 1, 1], [], []>} : vector<128x32xf32>, vector<32x128xf32>, vector<128x128xf32> -> vector<128x128xf32>
    %c0_3 = arith.constant 0 : index
    %c0_4 = arith.constant 0 : index
    %3 = vector.load %arg3[%c0_3, %c0_4] : memref<1x128xf32, #tpu.memory_space<vmem>>, vector<1x128xf32>
    %4 = vector.broadcast %3 : vector<1x128xf32> to vector<128x128xf32>
    %5 = arith.addf %2, %4 : vector<128x128xf32>
    %c0_5 = arith.constant 0 : index
    %c0_6 = arith.constant 0 : index
    %6 = vector.load %arg4[%c0_5, %c0_6] : memref<128x128xf32, #tpu.memory_space<vmem>>, vector<128x128xf32>
    tpu.vector_store %arg4[%c0_5, %c0_6], %5 {strides = array<i32>} : memref<128x128xf32, #tpu.memory_space<vmem>>, vector<128x128xf32>,
    return
  }
  func.func @transform_0(%arg0: i32) -> (i32, i32) {
    %c0_i32 = arith.constant 0 : i32
    %c0_i32_0 = arith.constant 0 : i32
    return %arg0, %c0_i32 : i32, i32
  }
  func.func @transform_1(%arg0: i32) -> (i32, i32) {
    %c0_i32 = arith.constant 0 : i32
    %c0_i32_0 = arith.constant 0 : i32
    %c0_i32_1 = arith.constant 0 : i32
    return %c0_i32, %c0_i32_0 : i32, i32
  }
  func.func @transform_2(%arg0: i32) -> (i32, i32) {
    %c0_i32 = arith.constant 0 : i32
    %c0_i32_0 = arith.constant 0 : i32
    %c0_i32_1 = arith.constant 0 : i32
    return %c0_i32, %c0_i32_0 : i32, i32
  }
  func.func @transform_3(%arg0: i32) -> (i32, i32) {
    %c0_i32 = arith.constant 0 : i32
    %c0_i32_0 = arith.constant 0 : i32
    return %arg0, %c0_i32 : i32, i32
  }
}

</mosaic_0001>

<bundles_post_ra>
// kernel: hmm_embedder.1
= control target key start
LH: loop header
LB: loop body
LE: loop exit
PB: predicated region body
PF: predicated region fallthrough
CT: control target
= control target key end

     0   :  { %8 = vsyncpa [#allocation3], 0  ;;  %s545_s0 = inlined_call_operand.hbm [shape: f32[128,32], index: 0, kind: input, shape index: {}]   ;;  %s546_s1 = inlined_call_operand.hbm [shape: f32[32,128], index: 1, kind: input, shape index: {}]   ;;  %s547_s2 = inlined_call_operand.vmem [shape: f32[1,128], index: 2, kind: input, shape index: {}]   ;;  %s548_s3 = inlined_call_operand.hbm [shape: f32[128,128], index: 3, kind: output, shape index: {}]  }
   0x1   :  { %9 = vsyncpa [#allocation6], 0 }
   0x2   :  { %10 = vsyncpa [#allocation4], 0  ;;  %s456_s12 = smov [#allocation2]   ;;  %s384_s16 = scalar_lea.hbm %s545_s0, 2048 }
   0x3   :  { %s16_s13 = sshll.u32 %s456_s12, 4  ;;  %p385_p0 = scmp.ne.s32.totalorder %s545_s0, %s384_s16  ;;  %s17_s13 = int_to_ptr.vmem [resolvable:$true] %s16_s13 }
   0x4   :  { %p388_p1 = scmp.lt.u32.totalorder %s384_s16, %s545_s0 }
   0x6   :  { %p390_p2 = pnand %p388_p1, %p385_p0 }
   0x8   :  { %393 = shalt.err (!%p390_p2)
}
   0x9   :  { %s394_s21 = scalar_lea.vmem %s17_s13, 2048  ;;  %p399_p4 = scmp.lt.s32.totalorder %s17_s13, %s17_s13 }
   0xa   :  { %p395_p3 = scmp.ne.s32.totalorder %s17_s13, %s394_s21  ;;  %p400_p5 = scmp.lt.s32.totalorder %s394_s21, %s394_s21 }
   0xc   :  { %p401_p6 = por %p400_p5, %p399_p4 }
   0xe   :  { %p402_p7 = pnand %p401_p6, %p395_p3 }
  0x10   :  { %405 = shalt.err (!%p402_p7)
}
  0x11   :  { %s457_s22 = smov 128   ;;  %s458_s23 = smov 8  }
  0x12   :  { %22 = dma.hbm_to_vmem [thread:$0]  %s545_s0, 2048, %s17_s13, [#allocation3], %s457_s22, %s457_s22, %s458_s23  }
  0x13   :  { %s459_s26 = smov [#allocation5]   ;;  %s406_s30 = scalar_lea.hbm %s546_s1, 512 }
  0x14   :  { %s28_s27 = sshll.u32 %s459_s26, 4  ;;  %p407_p8 = scmp.ne.s32.totalorder %s546_s1, %s406_s30  ;;  %s29_s27 = int_to_ptr.vmem [resolvable:$true] %s28_s27 }
  0x15   :  { %p410_p9 = scmp.lt.u32.totalorder %s406_s30, %s546_s1 }
  0x17   :  { %p412_p10 = pnand %p410_p9, %p407_p8 }
  0x19   :  { %415 = shalt.err (!%p412_p10)
}
  0x1a   :  { %s416_s8 = scalar_lea.vmem %s29_s27, 512  ;;  %p421_p12 = scmp.lt.s32.totalorder %s29_s27, %s29_s27 }
  0x1b   :  { %p417_p11 = scmp.ne.s32.totalorder %s29_s27, %s416_s8  ;;  %p422_p13 = scmp.lt.s32.totalorder %s416_s8, %s416_s8 }
  0x1d   :  { %p423_p0 = por %p422_p13, %p421_p12 }
  0x1f   :  { %p424_p1 = pnand %p423_p0, %p417_p11 }
  0x21   :  { %427 = shalt.err (!%p424_p1)
}
  0x22   :  { %34 = dma.hbm_to_vmem [thread:$0]  %s546_s1, 512, %s29_s27, [#allocation6], %s457_s22, %s457_s22, %s458_s23  }
  0x23   :  { %450 = dma.done.wait [#allocation3], 2048  }
  0x24   :  { %451 = vsyncadd [#allocation3], 4294965248 }
  0x25   :  { %452 = dma.done.wait [#allocation6], 512  }
  0x26   :  { %453 = vsyncadd [#allocation6], 4294966784  ;;  %vm70_vm0 = vcmask 261120   ;;  %v59_v0 = vld [vmem:[#allocation5] sm:$0xff]  ;;  %v60_v1 = vld [vmem:[#allocation5 + $0x8] sm:$0xff] }
  0x27   :  { %v61_v2 = vld [vmem:[#allocation5 + $0x10] sm:$0xff]  ;;  %v367_v3 = vpack.c.bf16 %v60_v1, %v59_v0  ;;  %v62_v4 = vld [vmem:[#allocation5 + $0x18] sm:$0xff]  ;;  %v43_v5 = vld [vmem:[#allocation2] sm:$0xff] }
  0x28   :  { %v51_v6 = vld [vmem:[#allocation2 + $0x40] sm:$0xff]  ;;  %v371_v7 = vpack.c.bf16 %v62_v4, %v61_v2  ;;  %343 = vmatprep.mubr.msk.f32.mxu0 %vm70_vm0, %v43_v5  ;;  %v44_v8 = vld [vmem:[#allocation2 + $0x8] sm:$0xff]  ;;  %v45_v10 = vld [vmem:[#allocation2 + $0x10] sm:$0xff] }
  0x29   :  { %355 = vmatprep.mubr.msk.f32.mxu1 %vm70_vm0, %v51_v6  ;;  %368 = vmatprep.subr.bf16.mxu0 %v367_v3  ;;  %v52_v9 = vld [vmem:[#allocation2 + $0x48] sm:$0xff]  ;;  %v53_v11 = vld [vmem:[#allocation2 + $0x50] sm:$0xff]  ;;  %v46_v12 = vld [vmem:[#allocation2 + $0x18] sm:$0xff] }
  0x2a   :  { %375 = vmatprep.subr.bf16.mxu1 %v367_v3  ;;  %370 = vmatpush3.bf16.msra.mxu0 %v367_v3  ;;  %v54_v13 = vld [vmem:[#allocation2 + $0x58] sm:$0xff]  ;;  %v47_v14 = vld [vmem:[#allocation2 + $0x20] sm:$0xff]  ;;  %v48_v16 = vld [vmem:[#allocation2 + $0x28] sm:$0xff] }
  0x2b   :  { %377 = vmatpush3.bf16.msra.mxu1 %v367_v3  ;;  %372 = vmatprep.subr.bf16.mxu0 %v371_v7  ;;  %v55_v15 = vld [vmem:[#allocation2 + $0x60] sm:$0xff]  ;;  %v56_v17 = vld [vmem:[#allocation2 + $0x68] sm:$0xff]  ;;  %v49_v18 = vld [vmem:[#allocation2 + $0x30] sm:$0xff] }
  0x2c   :  { %376 = vmatprep.subr.bf16.mxu1 %v371_v7  ;;  %v57_v19 = vld [vmem:[#allocation2 + $0x70] sm:$0xff]  ;;  %v50_v20 = vld [vmem:[#allocation2 + $0x38] sm:$0xff]  ;;  %v298_v22 = vld [vmem:[%s547_s2] ss:$0 sm:$0xff]  ;;  %s460_s2 = smov [#allocation7]  }
  0x2d   :  { %v58_v21 = vld [vmem:[#allocation2 + $0x78] sm:$0xff]  ;;  %s285_s11 = sshll.u32 %s460_s2, 4  ;;  %s286_s11 = int_to_ptr.vmem [resolvable:$true] %s285_s11 }
  0x2e   :  { %374 = vmatpush3.bf16.msra.mxu0 %v371_v7  ;;  %s428_s12 = scalar_lea.vmem %s286_s11, 2048  ;;  %p433_p3 = scmp.lt.s32.totalorder %s286_s11, %s286_s11 }
  0x2f   :  { %378 = vmatpush3.bf16.msra.mxu1 %v371_v7  ;;  %p429_p2 = scmp.ne.s32.totalorder %s286_s11, %s428_s12  ;;  %p434_p4 = scmp.lt.s32.totalorder %s428_s12, %s428_s12 }
  0x31   :  { %344 = vmatmul.mubr.msk.f32.vlgmr.msra.gmra.mrb[0].mxu0 %vm70_vm0, %v44_v8  ;;  %p435_p5 = por %p434_p4, %p433_p3 }
  0x32   :  { %356 = vmatmul.mubr.msk.f32.vlgmr.msra.gmra.mrb[0].mxu1 %vm70_vm0, %v52_v9  ;;  %346 = vmatprep.mubr.msk.f32.mxu0 %vm70_vm0, %v45_v10 }
  0x33   :  { %358 = vmatprep.mubr.msk.f32.mxu1 %vm70_vm0, %v53_v11  ;;  %p436_p6 = pnand %p435_p5, %p429_p2 }
  0x35   :  { %347 = vmatmul.mubr.msk.f32.gmra.mrb[2].mxu0 %vm70_vm0, %v46_v12 }
  0x36   :  { %359 = vmatmul.mubr.msk.f32.gmra.mrb[2].mxu1 %vm70_vm0, %v54_v13  ;;  %349 = vmatprep.mubr.msk.f32.mxu0 %vm70_vm0, %v47_v14 }
  0x37   :  { %361 = vmatprep.mubr.msk.f32.mxu1 %vm70_vm0, %v55_v15 }
  0x39   :  { %350 = vmatmul.mubr.msk.f32.gmra.mrb[4].mxu0 %vm70_vm0, %v48_v16 }
  0x3a   :  { %362 = vmatmul.mubr.msk.f32.gmra.mrb[4].mxu1 %vm70_vm0, %v56_v17  ;;  %352 = vmatprep.mubr.msk.f32.mxu0 %vm70_vm0, %v49_v18 }
  0x3b   :  { %364 = vmatprep.mubr.msk.f32.mxu1 %vm70_vm0, %v57_v19 }
  0x3d   :  { %353 = vmatmul.mubr.msk.f32.gmra.mrb[6].mxu0 %vm70_vm0, %v50_v20 }
  0x3e   :  { %365 = vmatmul.mubr.msk.f32.gmra.mrb[6].mxu1 %vm70_vm0, %v58_v21 }
 0x104   :  { %v345_v23 = vpop.f32.mrb[0].mxu0 }
 0x105   :  { %v357_v24 = vpop.f32.mrb[0].mxu1  ;;  %v191_v25 = vadd.f32 %v345_v23, %v298_v22  ;;  %v185_v27 = vpop.f32.mrb[1].mxu0 }
 0x106   :  { %v231_v26 = vadd.f32 %v357_v24, %v298_v22  ;;  %v225_v28 = vpop.f32.mrb[1].mxu1  ;;  %v186_v29 = vadd.f32 %v298_v22, %v185_v27 }
 0x107   :  { %v226_v30 = vadd.f32 %v298_v22, %v225_v28  ;;  %265 = vst [vmem:[#allocation7 + $0x8] sm:$0xff] %v191_v25 }
 0x108   :  { %273 = vst [vmem:[#allocation7 + $0x48] sm:$0xff] %v231_v26  ;;  %264 = vst [vmem:[#allocation7] sm:$0xff] %v186_v29  ;;  %v348_v31 = vpop.f32.mrb[2].mxu0 }
 0x109   :  { %272 = vst [vmem:[#allocation7 + $0x40] sm:$0xff] %v226_v30  ;;  %v360_v32 = vpop.f32.mrb[2].mxu1  ;;  %v201_v33 = vadd.f32 %v348_v31, %v298_v22  ;;  %v195_v35 = vpop.f32.mrb[3].mxu0 }
 0x10a   :  { %v241_v34 = vadd.f32 %v360_v32, %v298_v22  ;;  %v235_v36 = vpop.f32.mrb[3].mxu1  ;;  %v196_v37 = vadd.f32 %v298_v22, %v195_v35 }
 0x10b   :  { %v236_v38 = vadd.f32 %v298_v22, %v235_v36  ;;  %267 = vst [vmem:[#allocation7 + $0x18] sm:$0xff] %v201_v33 }
 0x10c   :  { %275 = vst [vmem:[#allocation7 + $0x58] sm:$0xff] %v241_v34  ;;  %266 = vst [vmem:[#allocation7 + $0x10] sm:$0xff] %v196_v37  ;;  %v351_v39 = vpop.f32.mrb[4].mxu0 }
 0x10d   :  { %274 = vst [vmem:[#allocation7 + $0x50] sm:$0xff] %v236_v38  ;;  %v363_v40 = vpop.f32.mrb[4].mxu1  ;;  %v211_v41 = vadd.f32 %v351_v39, %v298_v22  ;;  %v205_v43 = vpop.f32.mrb[5].mxu0 }
 0x10e   :  { %v251_v42 = vadd.f32 %v363_v40, %v298_v22  ;;  %v245_v44 = vpop.f32.mrb[5].mxu1  ;;  %v206_v45 = vadd.f32 %v298_v22, %v205_v43 }
 0x10f   :  { %v246_v46 = vadd.f32 %v298_v22, %v245_v44  ;;  %269 = vst [vmem:[#allocation7 + $0x28] sm:$0xff] %v211_v41 }
 0x110   :  { %277 = vst [vmem:[#allocation7 + $0x68] sm:$0xff] %v251_v42  ;;  %268 = vst [vmem:[#allocation7 + $0x20] sm:$0xff] %v206_v45  ;;  %v354_v47 = vpop.f32.mrb[6].mxu0 }
 0x111   :  { %276 = vst [vmem:[#allocation7 + $0x60] sm:$0xff] %v246_v46  ;;  %v366_v48 = vpop.f32.mrb[6].mxu1  ;;  %v221_v49 = vadd.f32 %v354_v47, %v298_v22  ;;  %v215_v51 = vpop.f32.mrb[7].mxu0 }
 0x112   :  { %v261_v50 = vadd.f32 %v366_v48, %v298_v22  ;;  %v255_v52 = vpop.f32.mrb[7].mxu1  ;;  %v216_v53 = vadd.f32 %v298_v22, %v215_v51 }
 0x113   :  { %v256_v54 = vadd.f32 %v298_v22, %v255_v52  ;;  %271 = vst [vmem:[#allocation7 + $0x38] sm:$0xff] %v221_v49 }
 0x114   :  { %279 = vst [vmem:[#allocation7 + $0x78] sm:$0xff] %v261_v50  ;;  %270 = vst [vmem:[#allocation7 + $0x30] sm:$0xff] %v216_v53 }
 0x115   :  { %278 = vst [vmem:[#allocation7 + $0x70] sm:$0xff] %v256_v54 }
 0x116   :  { %439 = shalt.err (!%p436_p6)
}
 0x117   :  { %s440_s15 = scalar_lea.hbm %s548_s3, 2048 }
 0x118   :  { %p441_p7 = scmp.ne.s32.totalorder %s548_s3, %s440_s15  ;;  %p444_p8 = scmp.lt.u32.totalorder %s440_s15, %s548_s3 }
 0x11a   :  { %p446_p9 = pnand %p444_p8, %p441_p7 }
 0x11c   :  { %449 = shalt.err (!%p446_p9)
}
 0x11d   :  { %291 = dma.vmem_to_hbm [thread:$0]  %s286_s11, 2048, %s548_s3, [#allocation4], %s457_s22, %s457_s22, %s458_s23  }
 0x11e   :  { %454 = dma.done.wait [#allocation4], 2048  }
 0x11f   :  { %455 = vsyncadd [#allocation4], 4294965248 }
 0x120   :  { %295 = vsyncpa [#allocation3], 1 }
 0x121   :  { %296 = vsyncpa [#allocation6], 1 }
 0x122   :  { %297 = vsyncpa [#allocation4], 1 }

</bundles_post_ra>
